<compile_context>
chip_gen: v7x
topology: tpu7x:2x2x1
jax: 0.10.0
libtpu: 0.0.40
codegen_flags: <defaults>
</compile_context>

<pallas_src>
import functools

import jax
import jax.numpy as jnp
from jax.experimental import pallas as pl
from jax.experimental.pallas import tpu as pltpu

NEG_SLOPE = 0.9  # LeakyReLU(0.9) as in the module


def _leaky(v, slope):
    return jnp.where(v >= 0, v, slope * v)


# ----------------------------- Fused CNN2 forward kernel ---------------------
def cnn2_kernel(x_ref, w1_ref, b1_ref, w2_ref, b2_ref,
                w3_ref, b3_ref, wc_ref, bc_ref, o_ref, *, neg_slope):
    """Whole CNN2 forward in one kernel; all refs fully resident in VMEM.

    x_ref  : (B, L, Cin)       channels-last input (== PyTorch x before permute)
    w1_ref : (3, Cin, C1)      conv1 weight, tap-major, (ci, co)-transposed
    b1_ref : (1, C1)
    w2_ref : (3, C1, C2)       conv2 weight
    b2_ref : (1, C2)
    w3_ref : (L4*C2, latent)   linear3 weight with columns re-ordered for the
                               kernel's (l, c) flatten order
    b3_ref : (1, latent)
    wc_ref : (latent, num_class)
    bc_ref : (1, num_class)
    o_ref  : (B, num_class)    log-softmax output
    """

    def conv_leaky_pool(x, w_ref, b_ref):
        # Conv1d(kernel=3, stride=1, padding=1) as 3 shift-matmuls with a tall
        # (B*L, Ci) LHS, then LeakyReLU(0.9) and max_pool1d(2) along L.
        Bb, Ll, Ci = x.shape
        Co = b_ref.shape[-1]
        zrow = jnp.zeros((Bb, 1, Ci), jnp.float32)
        xp = jnp.concatenate([zrow, x, zrow], axis=1)            # (B, L+2, Ci)
        acc = jnp.zeros((Bb * Ll, Co), jnp.float32)
        for k in range(3):                                       # static unroll
            xs = xp[:, k:k + Ll, :].reshape(Bb * Ll, Ci)
            acc = acc + jnp.dot(xs, w_ref[k],
                                preferred_element_type=jnp.float32)
        y = _leaky(acc + b_ref[...], neg_slope)                  # (B*L, Co)
        y = y.reshape(Bb, Ll // 2, 2, Co)
        return jnp.max(y, axis=2)                                # (B, L//2, Co)

    h = conv_leaky_pool(x_ref[...], w1_ref, b1_ref)              # (B, L/2, C1)
    h = conv_leaky_pool(h, w2_ref, b2_ref)                       # (B, L/4, C2)

    Bb, L4, C2 = h.shape
    h = h.reshape(Bb, L4 * C2)                                   # (B, Fin3) in (l, c) order
    h = _leaky(jnp.dot(h, w3_ref[...],
                       preferred_element_type=jnp.float32) + b3_ref[...],
               neg_slope)                                        # linear3 + LeakyReLU
    z = _leaky(jnp.dot(h, wc_ref[...],
                       preferred_element_type=jnp.float32) + bc_ref[...],
               neg_slope)                                        # classifier + LeakyReLU

    # LogSoftmax(dim=1), numerically stable.
    z = z - jnp.max(z, axis=1, keepdims=True)
    z = z - jnp.log(jnp.sum(jnp.exp(z), axis=1, keepdims=True))
    o_ref[...] = z.astype(o_ref.dtype)


# ----------------------------- Wrapper ---------------------------------------
def cnn2_forward(x, p):
    B, L, Cin = x.shape
    C1 = p["b1"].shape[-1]
    C2 = p["b2"].shape[-1]
    latent = p["b3"].shape[-1]
    num_class = p["bc"].shape[-1]
    L2, L4 = L // 2, L // 4

    flops = 2 * (B * L * (3 * Cin) * C1          # conv1 (3 taps)
                 + B * L2 * (3 * C1) * C2        # conv2
                 + B * (L4 * C2) * latent        # linear3
                 + B * latent * num_class)       # classifier
    param_names = ("w1_t", "b1", "w2_t", "b2", "w3_t", "b3", "wc_t", "bc")
    bytes_accessed = 4 * (x.size + sum(int(p[k].size) for k in param_names)
                          + B * num_class)

    kern = functools.partial(cnn2_kernel, neg_slope=NEG_SLOPE)
    return pl.pallas_call(
        kern,
        out_shape=jax.ShapeDtypeStruct((B, num_class), jnp.float32),
        in_specs=[pl.BlockSpec(memory_space=pltpu.MemorySpace.VMEM)] * 9,
        out_specs=pl.BlockSpec(memory_space=pltpu.MemorySpace.VMEM),
        cost_estimate=pl.CostEstimate(flops=flops,
                                      transcendentals=2 * B * num_class,
                                      bytes_accessed=bytes_accessed),
    )(x, p["w1_t"], p["b1"], p["w2_t"], p["b2"],
      p["w3_t"], p["b3"], p["wc_t"], p["bc"])


# ----------------------------- Params (PyTorch layout -> kernel layout) ------
def init_params(key, input_size, latent_size, num_class, max_len):
    assert max_len % 4 == 0, "max_len must be divisible by 4 (two maxpool(2))"

    def uni(k, shape, fan_in):
        s = 1.0 / jnp.sqrt(fan_in)
        return jax.random.uniform(k, shape, jnp.float32, -s, s)

    ks = iter(jax.random.split(key, 8))
    C1, C2 = latent_size, 2 * latent_size
    L4 = max_len // 4
    fin3 = C2 * L4

    # PyTorch-layout parameters.
    w1 = uni(next(ks), (C1, input_size, 3), input_size * 3)   # Conv1d weight
    b1 = uni(next(ks), (C1,), input_size * 3)
    w2 = uni(next(ks), (C2, C1, 3), C1 * 3)
    b2 = uni(next(ks), (C2,), C1 * 3)
    w3 = uni(next(ks), (latent_size, fin3), fin3)             # Linear weight
    b3 = uni(next(ks), (latent_size,), fin3)
    wc = uni(next(ks), (num_class, latent_size), latent_size)
    bc = uni(next(ks), (num_class,), latent_size)

    # One-time layout prep (kept OUT of the per-forward-call path).
    p = {}
    p["w1_t"] = jnp.transpose(w1, (2, 1, 0))                  # (3, Cin, C1)
    p["b1"] = b1.reshape(1, C1)
    p["w2_t"] = jnp.transpose(w2, (2, 1, 0))                  # (3, C1, C2)
    p["b2"] = b2.reshape(1, C2)
    # PyTorch flattens (B, C2, L4) channel-major; the kernel flattens
    # (B, L4, C2) spatial-major -> permute linear3's input columns once here.
    p["w3_t"] = jnp.transpose(w3.reshape(latent_size, C2, L4),
                              (2, 1, 0)).reshape(L4 * C2, latent_size)
    p["b3"] = b3.reshape(1, latent_size)
    p["wc_t"] = wc.T                                          # (latent, num_class)
    p["bc"] = bc.reshape(1, num_class)
    return p


if __name__ == "__main__":
    # Small, module-consistent shapes: x is (batch, max_len, input_size).
    B = 2
    input_size = 4
    latent_size = 32
    num_class = 5
    max_len = 16

    key = jax.random.PRNGKey(0)
    kx, kp = jax.random.split(key)
    x = jax.random.normal(kx, (B, max_len, input_size), jnp.float32)
    params = init_params(kp, input_size, latent_size, num_class, max_len)

    out = jax.jit(cnn2_forward)(x, params)
    out = jax.block_until_ready(out)

    assert out.shape == (B, num_class)
    assert bool(jnp.all(jnp.isfinite(out)))
    # log-softmax rows should sum to ~1 in probability space
    assert bool(jnp.allclose(jnp.sum(jnp.exp(out), axis=1), 1.0, atol=1e-4))
    print("KERNEL_OK")
</pallas_src>

<mosaic_0001>
module attributes {stable_mosaic.version = 11 : i64} {
  func.func @cnn2_kernel(%arg0: memref<2x16x4xf32, #tpu.memory_space<vmem>>, %arg1: memref<3x4x32xf32, #tpu.memory_space<vmem>>, %arg2: memref<1x32xf32, #tpu.memory_space<vmem>>, %arg3: memref<3x32x64xf32, #tpu.memory_space<vmem>>, %arg4: memref<1x64xf32, #tpu.memory_space<vmem>>, %arg5: memref<256x32xf32, #tpu.memory_space<vmem>>, %arg6: memref<1x32xf32, #tpu.memory_space<vmem>>, %arg7: memref<32x5xf32, #tpu.memory_space<vmem>>, %arg8: memref<1x5xf32, #tpu.memory_space<vmem>>, %arg9: memref<2x5xf32, #tpu.memory_space<vmem>>) attributes {dimension_semantics = [], scalar_prefetch = 0 : i64, scratch_operands = 0 : i64, tpu.core_type = #tpu.core_type<tc>} {
    %c0 = arith.constant 0 : index
    %c0_0 = arith.constant 0 : index
    %c0_1 = arith.constant 0 : index
    %0 = vector.load %arg0[%c0, %c0_0, %c0_1] : memref<2x16x4xf32, #tpu.memory_space<vmem>>, vector<2x16x4xf32>
    %cst = arith.constant 0.000000e+00 : f32
    %1 = vector.broadcast %cst : f32 to vector<2x1x4xf32>
    %2 = tpu.concatenate %1, %0, %1 in 1 : vector<2x1x4xf32>, vector<2x16x4xf32>, vector<2x1x4xf32> -> vector<2x18x4xf32>
    %cst_2 = arith.constant 0.000000e+00 : f32
    %3 = vector.broadcast %cst_2 : f32 to vector<32x32xf32>
    %4 = vector.extract_strided_slice %2 {offsets = [0, 0, 0], sizes = [2, 16, 4], strides = [1, 1, 1]} : vector<2x18x4xf32> to vector<2x16x4xf32>
    %5 = vector.shape_cast %4 : vector<2x16x4xf32> to vector<32x4xf32>
    %c0_3 = arith.constant 0 : index
    %c0_4 = arith.constant 0 : index
    %c0_5 = arith.constant 0 : index
    %6 = vector.load %arg1[%c0_3, %c0_4, %c0_5] : memref<3x4x32xf32, #tpu.memory_space<vmem>>, vector<1x4x32xf32>
    %7 = vector.shape_cast %6 : vector<1x4x32xf32> to vector<4x32xf32>
    %cst_6 = arith.constant dense<0.000000e+00> : vector<32x32xf32>
    %8 = tpu.matmul %5, %7, %cst_6 {dimension_numbers = #tpu.dot_dimension_numbers<[1], [0], [0], [1], [0, 0, 1, 1], [], []>} : vector<32x4xf32>, vector<4x32xf32>, vector<32x32xf32> -> vector<32x32xf32>
    %9 = arith.addf %3, %8 : vector<32x32xf32>
    %10 = vector.extract_strided_slice %2 {offsets = [0, 1, 0], sizes = [2, 16, 4], strides = [1, 1, 1]} : vector<2x18x4xf32> to vector<2x16x4xf32>
    %11 = vector.shape_cast %10 : vector<2x16x4xf32> to vector<32x4xf32>
    %c1 = arith.constant 1 : index
    %c0_7 = arith.constant 0 : index
    %c0_8 = arith.constant 0 : index
    %12 = vector.load %arg1[%c1, %c0_7, %c0_8] : memref<3x4x32xf32, #tpu.memory_space<vmem>>, vector<1x4x32xf32>
    %13 = vector.shape_cast %12 : vector<1x4x32xf32> to vector<4x32xf32>
    %cst_9 = arith.constant dense<0.000000e+00> : vector<32x32xf32>
    %14 = tpu.matmul %11, %13, %cst_9 {dimension_numbers = #tpu.dot_dimension_numbers<[1], [0], [0], [1], [0, 0, 1, 1], [], []>} : vector<32x4xf32>, vector<4x32xf32>, vector<32x32xf32> -> vector<32x32xf32>
    %15 = arith.addf %9, %14 : vector<32x32xf32>
    %16 = vector.extract_strided_slice %2 {offsets = [0, 2, 0], sizes = [2, 16, 4], strides = [1, 1, 1]} : vector<2x18x4xf32> to vector<2x16x4xf32>
    %17 = vector.shape_cast %16 : vector<2x16x4xf32> to vector<32x4xf32>
    %c2 = arith.constant 2 : index
    %c0_10 = arith.constant 0 : index
    %c0_11 = arith.constant 0 : index
    %18 = vector.load %arg1[%c2, %c0_10, %c0_11] : memref<3x4x32xf32, #tpu.memory_space<vmem>>, vector<1x4x32xf32>
    %19 = vector.shape_cast %18 : vector<1x4x32xf32> to vector<4x32xf32>
    %cst_12 = arith.constant dense<0.000000e+00> : vector<32x32xf32>
    %20 = tpu.matmul %17, %19, %cst_12 {dimension_numbers = #tpu.dot_dimension_numbers<[1], [0], [0], [1], [0, 0, 1, 1], [], []>} : vector<32x4xf32>, vector<4x32xf32>, vector<32x32xf32> -> vector<32x32xf32>
    %21 = arith.addf %15, %20 : vector<32x32xf32>
    %c0_13 = arith.constant 0 : index
    %c0_14 = arith.constant 0 : index
    %22 = vector.load %arg2[%c0_13, %c0_14] : memref<1x32xf32, #tpu.memory_space<vmem>>, vector<1x32xf32>
    %23 = vector.broadcast %22 : vector<1x32xf32> to vector<32x32xf32>
    %24 = arith.addf %21, %23 : vector<32x32xf32>
    %cst_15 = arith.constant 0.000000e+00 : f32
    %25 = vector.broadcast %cst_15 : f32 to vector<32x32xf32>
    %26 = arith.cmpf oge, %24, %25 : vector<32x32xf32>
    %cst_16 = arith.constant 0.899999976 : f32
    %27 = vector.broadcast %cst_16 : f32 to vector<32x32xf32>
    %28 = arith.mulf %27, %24 : vector<32x32xf32>
    %29 = arith.select %26, %24, %28 : vector<32x32xi1>, vector<32x32xf32>
    %30 = vector.shape_cast %29 : vector<32x32xf32> to vector<2x8x2x32xf32>
    %cst_17 = arith.constant dense<0xFF800000> : vector<2x8x32xf32>
    %31 = vector.multi_reduction <maximumf>, %30, %cst_17 [2] : vector<2x8x2x32xf32> to vector<2x8x32xf32>
    %cst_18 = arith.constant 0.000000e+00 : f32
    %32 = vector.broadcast %cst_18 : f32 to vector<2x1x32xf32>
    %33 = tpu.concatenate %32, %31, %32 in 1 : vector<2x1x32xf32>, vector<2x8x32xf32>, vector<2x1x32xf32> -> vector<2x10x32xf32>
    %cst_19 = arith.constant 0.000000e+00 : f32
    %34 = vector.broadcast %cst_19 : f32 to vector<16x64xf32>
    %35 = vector.extract_strided_slice %33 {offsets = [0, 0, 0], sizes = [2, 8, 32], strides = [1, 1, 1]} : vector<2x10x32xf32> to vector<2x8x32xf32>
    %36 = vector.shape_cast %35 : vector<2x8x32xf32> to vector<16x32xf32>
    %c0_20 = arith.constant 0 : index
    %c0_21 = arith.constant 0 : index
    %c0_22 = arith.constant 0 : index
    %37 = vector.load %arg3[%c0_20, %c0_21, %c0_22] : memref<3x32x64xf32, #tpu.memory_space<vmem>>, vector<1x32x64xf32>
    %38 = vector.shape_cast %37 : vector<1x32x64xf32> to vector<32x64xf32>
    %cst_23 = arith.constant dense<0.000000e+00> : vector<16x64xf32>
    %39 = tpu.matmul %36, %38, %cst_23 {dimension_numbers = #tpu.dot_dimension_numbers<[1], [0], [0], [1], [0, 0, 1, 1], [], []>} : vector<16x32xf32>, vector<32x64xf32>, vector<16x64xf32> -> vector<16x64xf32>
    %40 = arith.addf %34, %39 : vector<16x64xf32>
    %41 = vector.extract_strided_slice %33 {offsets = [0, 1, 0], sizes = [2, 8, 32], strides = [1, 1, 1]} : vector<2x10x32xf32> to vector<2x8x32xf32>
    %42 = vector.shape_cast %41 : vector<2x8x32xf32> to vector<16x32xf32>
    %c1_24 = arith.constant 1 : index
    %c0_25 = arith.constant 0 : index
    %c0_26 = arith.constant 0 : index
    %43 = vector.load %arg3[%c1_24, %c0_25, %c0_26] : memref<3x32x64xf32, #tpu.memory_space<vmem>>, vector<1x32x64xf32>
    %44 = vector.shape_cast %43 : vector<1x32x64xf32> to vector<32x64xf32>
    %cst_27 = arith.constant dense<0.000000e+00> : vector<16x64xf32>
    %45 = tpu.matmul %42, %44, %cst_27 {dimension_numbers = #tpu.dot_dimension_numbers<[1], [0], [0], [1], [0, 0, 1, 1], [], []>} : vector<16x32xf32>, vector<32x64xf32>, vector<16x64xf32> -> vector<16x64xf32>
    %46 = arith.addf %40, %45 : vector<16x64xf32>
    %47 = vector.extract_strided_slice %33 {offsets = [0, 2, 0], sizes = [2, 8, 32], strides = [1, 1, 1]} : vector<2x10x32xf32> to vector<2x8x32xf32>
    %48 = vector.shape_cast %47 : vector<2x8x32xf32> to vector<16x32xf32>
    %c2_28 = arith.constant 2 : index
    %c0_29 = arith.constant 0 : index
    %c0_30 = arith.constant 0 : index
    %49 = vector.load %arg3[%c2_28, %c0_29, %c0_30] : memref<3x32x64xf32, #tpu.memory_space<vmem>>, vector<1x32x64xf32>
    %50 = vector.shape_cast %49 : vector<1x32x64xf32> to vector<32x64xf32>
    %cst_31 = arith.constant dense<0.000000e+00> : vector<16x64xf32>
    %51 = tpu.matmul %48, %50, %cst_31 {dimension_numbers = #tpu.dot_dimension_numbers<[1], [0], [0], [1], [0, 0, 1, 1], [], []>} : vector<16x32xf32>, vector<32x64xf32>, vector<16x64xf32> -> vector<16x64xf32>
    %52 = arith.addf %46, %51 : vector<16x64xf32>
    %c0_32 = arith.constant 0 : index
    %c0_33 = arith.constant 0 : index
    %53 = vector.load %arg4[%c0_32, %c0_33] : memref<1x64xf32, #tpu.memory_space<vmem>>, vector<1x64xf32>
    %54 = vector.broadcast %53 : vector<1x64xf32> to vector<16x64xf32>
    %55 = arith.addf %52, %54 : vector<16x64xf32>
    %cst_34 = arith.constant 0.000000e+00 : f32
    %56 = vector.broadcast %cst_34 : f32 to vector<16x64xf32>
    %57 = arith.cmpf oge, %55, %56 : vector<16x64xf32>
    %cst_35 = arith.constant 0.899999976 : f32
    %58 = vector.broadcast %cst_35 : f32 to vector<16x64xf32>
    %59 = arith.mulf %58, %55 : vector<16x64xf32>
    %60 = arith.select %57, %55, %59 : vector<16x64xi1>, vector<16x64xf32>
    %61 = vector.shape_cast %60 : vector<16x64xf32> to vector<2x4x2x64xf32>
    %cst_36 = arith.constant dense<0xFF800000> : vector<2x4x64xf32>
    %62 = vector.multi_reduction <maximumf>, %61, %cst_36 [2] : vector<2x4x2x64xf32> to vector<2x4x64xf32>
    %63 = vector.shape_cast %62 : vector<2x4x64xf32> to vector<2x256xf32>
    %c0_37 = arith.constant 0 : index
    %c0_38 = arith.constant 0 : index
    %64 = vector.load %arg5[%c0_37, %c0_38] : memref<256x32xf32, #tpu.memory_space<vmem>>, vector<256x32xf32>
    %cst_39 = arith.constant dense<0.000000e+00> : vector<2x32xf32>
    %65 = tpu.matmul %63, %64, %cst_39 {dimension_numbers = #tpu.dot_dimension_numbers<[1], [0], [0], [1], [0, 0, 1, 1], [], []>} : vector<2x256xf32>, vector<256x32xf32>, vector<2x32xf32> -> vector<2x32xf32>
    %c0_40 = arith.constant 0 : index
    %c0_41 = arith.constant 0 : index
    %66 = vector.load %arg6[%c0_40, %c0_41] : memref<1x32xf32, #tpu.memory_space<vmem>>, vector<1x32xf32>
    %67 = vector.broadcast %66 : vector<1x32xf32> to vector<2x32xf32>
    %68 = arith.addf %65, %67 : vector<2x32xf32>
    %cst_42 = arith.constant 0.000000e+00 : f32
    %69 = vector.broadcast %cst_42 : f32 to vector<2x32xf32>
    %70 = arith.cmpf oge, %68, %69 : vector<2x32xf32>
    %cst_43 = arith.constant 0.899999976 : f32
    %71 = vector.broadcast %cst_43 : f32 to vector<2x32xf32>
    %72 = arith.mulf %71, %68 : vector<2x32xf32>
    %73 = arith.select %70, %68, %72 : vector<2x32xi1>, vector<2x32xf32>
    %c0_44 = arith.constant 0 : index
    %c0_45 = arith.constant 0 : index
    %74 = vector.load %arg7[%c0_44, %c0_45] : memref<32x5xf32, #tpu.memory_space<vmem>>, vector<32x5xf32>
    %cst_46 = arith.constant dense<0.000000e+00> : vector<2x5xf32>
    %75 = tpu.matmul %73, %74, %cst_46 {dimension_numbers = #tpu.dot_dimension_numbers<[1], [0], [0], [1], [0, 0, 1, 1], [], []>} : vector<2x32xf32>, vector<32x5xf32>, vector<2x5xf32> -> vector<2x5xf32>
    %c0_47 = arith.constant 0 : index
    %c0_48 = arith.constant 0 : index
    %76 = vector.load %arg8[%c0_47, %c0_48] : memref<1x5xf32, #tpu.memory_space<vmem>>, vector<1x5xf32>
    %77 = vector.broadcast %76 : vector<1x5xf32> to vector<2x5xf32>
    %78 = arith.addf %75, %77 : vector<2x5xf32>
    %cst_49 = arith.constant 0.000000e+00 : f32
    %79 = vector.broadcast %cst_49 : f32 to vector<2x5xf32>
    %80 = arith.cmpf oge, %78, %79 : vector<2x5xf32>
    %cst_50 = arith.constant 0.899999976 : f32
    %81 = vector.broadcast %cst_50 : f32 to vector<2x5xf32>
    %82 = arith.mulf %81, %78 : vector<2x5xf32>
    %83 = arith.select %80, %78, %82 : vector<2x5xi1>, vector<2x5xf32>
    %cst_51 = arith.constant dense<0xFF800000> : vector<2xf32>
    %84 = vector.multi_reduction <maximumf>, %83, %cst_51 [1] : vector<2x5xf32> to vector<2xf32>
    %85 = vector.shape_cast %84 : vector<2xf32> to vector<2x1xf32>
    %86 = vector.broadcast %85 : vector<2x1xf32> to vector<2x5xf32>
    %87 = arith.subf %83, %86 : vector<2x5xf32>
    %88 = math.exp %87 : vector<2x5xf32>
    %cst_52 = arith.constant dense<0.000000e+00> : vector<2xf32>
    %89 = vector.multi_reduction <add>, %88, %cst_52 [1] : vector<2x5xf32> to vector<2xf32>
    %90 = vector.shape_cast %89 : vector<2xf32> to vector<2x1xf32>
    %91 = math.log %90 : vector<2x1xf32>
    %92 = vector.broadcast %91 : vector<2x1xf32> to vector<2x5xf32>
    %93 = arith.subf %87, %92 : vector<2x5xf32>
    %c0_53 = arith.constant 0 : index
    %c0_54 = arith.constant 0 : index
    %94 = vector.load %arg9[%c0_53, %c0_54] : memref<2x5xf32, #tpu.memory_space<vmem>>, vector<2x5xf32>
    tpu.vector_store %arg9[%c0_53, %c0_54], %93 {strides = array<i32>} : memref<2x5xf32, #tpu.memory_space<vmem>>, vector<2x5xf32>,
    return
  }
}

</mosaic_0001>

<bundles_post_ra>
// kernel: cnn2_forward.1
= control target key start
LH: loop header
LB: loop body
LE: loop exit
PB: predicated region body
PF: predicated region fallthrough
CT: control target
= control target key end

     0   :  { %vm83_vm0 = vcmask 1043456   ;;  %vm41_vm1 = vcmask 1040384   ;;  %vm74_vm2 = vcmask 31744   ;;  %vm61_vm3 = vcmask 1046528   ;;  %s1977_s0 = inlined_call_operand.vmem [shape: f32[2,16,4], index: 0, kind: input, shape index: {}]   ;;  %s1978_s1 = inlined_call_operand.vmem [shape: f32[3,4,32], index: 1, kind: input, shape index: {}]   ;;  %s1979_s2 = inlined_call_operand.vmem [shape: f32[1,32], index: 2, kind: input, shape index: {}]   ;;  %s1980_s3 = inlined_call_operand.vmem [shape: f32[3,32,64], index: 3, kind: input, shape index: {}]   ;;  %s1981_s4 = inlined_call_operand.vmem [shape: f32[1,64], index: 4, kind: input, shape index: {}]   ;;  %s1982_s5 = inlined_call_operand.vmem [shape: f32[256,32], index: 5, kind: input, shape index: {}]   ;;  %s1983_s6 = inlined_call_operand.vmem [shape: f32[1,32], index: 6, kind: input, shape index: {}]   ;;  %s1984_s7 = inlined_call_operand.vmem [shape: f32[32,5], index: 7, kind: input, shape index: {}]   ;;  %s1985_s8 = inlined_call_operand.vmem [shape: f32[1,5], index: 8, kind: input, shape index: {}]   ;;  %s1986_s9 = inlined_call_operand.hbm [shape: f32[2,5], index: 9, kind: output, shape index: {}]  }
   0x1   :  { %v56_v0 = vld [vmem:[%s1978_s1] sm:$0xf]  ;;  %v1331_v3 = vld [vmem:[%s1978_s1 + $0x8] sm:$0xf]  ;;  %v35_v5 = vld [vmem:[%s1977_s0 + $0x10] sm:$0xff]  ;;  %vm268_vm4 = vcmask 1045504  }
   0x2   :  { %v33_v1 = vld [vmem:[%s1977_s0] sm:$0xff]  ;;  %1437 = vmatprep.subr.msk.mxu0 %vm83_vm0, %v56_v0  ;;  %v34_v4 = vld [vmem:[%s1977_s0 + $0x8] sm:$0xff]  ;;  %v45_v7 = vrot.slane %v35_v5, 7  ;;  %v36_v8 = vld [vmem:[%s1977_s0 + $0x18] sm:$0xff] }
   0x3   :  { %v42_v2 = vrot.slane %v33_v1, 7  ;;  %1438 = vmatpush3.msk.msra.mxu0 %vm83_vm0, %v56_v0  ;;  %v43_v6 = vrot.slane %v34_v4, 7  ;;  %v1320_v9 = vld [vmem:[%s1978_s1 + $0x4] sm:$0xf]  ;;  %v46_v11 = vrot.slane %v36_v8, 7 }
   0x4   :  { %1445 = vmatprep.subr.msk.mxu0 %vm83_vm0, %v1331_v3  ;;  %1429 = vmatprep.subr.msk.mxu1 %vm83_vm0, %v1320_v9 }
   0x5   :  { %v52_v10 = vsel %vm41_vm1, 0.0, %v42_v2 }
   0x6   :  { %14 = vsyncpa [#allocation3], 0  ;;  %v62_v12 = vrot.slane %v52_v10, 1  ;;  %1439 = vmatprep.mubr.msk.f32.mxu0 %vm74_vm2, %v52_v10  ;;  %v269_v13 = vrot.slane %v52_v10, 2  ;;  %v44_v14 = vsel %vm41_vm1, %v42_v2, %v43_v6  ;;  %v53_v15 = vsel %vm41_vm1, 0.0, %v45_v7  ;;  %1430 = vmatpush3.msk.msra.mxu1 %vm83_vm0, %v1320_v9  ;;  %v1338_v37 = vld [vmem:[%s1980_s3 + $0x20] sm:$0xff] }
   0x7   :  { %1440 = vmatmul.mubr.msk.f32.vlgmr.msra.gmra.mrb[0].mxu0 %vm74_vm2, %v44_v14  ;;  %v270_v16 = vrot.slane %v44_v14, 2  ;;  %v67_v17 = vrot.slane %v53_v15, 1  ;;  %v274_v18 = vrot.slane %v53_v15, 2  ;;  %v47_v19 = vsel %vm41_vm1, %v45_v7, %v46_v11  ;;  %v1339_v38 = vld [vmem:[%s1980_s3 + $0x28] sm:$0xff]  ;;  %v1340_v40 = vld [vmem:[%s1980_s3 + $0x30] sm:$0xff]  ;;  %v1341_v41 = vld [vmem:[%s1980_s3 + $0x38] sm:$0xff] }
   0x8   :  { %1446 = vmatpush3.msk.msra.mxu0 %vm83_vm0, %v1331_v3  ;;  %1442 = vmatprep.mubr.msk.f32.mxu0 %vm74_vm2, %v53_v15  ;;  %v68_v20 = vrot.slane %v47_v19, 1  ;;  %v275_v21 = vrot.slane %v47_v19, 2  ;;  %v63_v22 = vrot.slane %v44_v14, 1  ;;  %v54_v23 = vsel %vm41_vm1, %v43_v6, 0.0  ;;  %v647_v43 = vld [vmem:[%s1980_s3] sm:$0xff]  ;;  %v648_v44 = vld [vmem:[%s1980_s3 + $0x8] sm:$0xff] }
   0x9   :  { %v65_v24 = vrot.slane %v54_v23, 1  ;;  %v272_v25 = vrot.slane %v54_v23, 2  ;;  %v271_v26 = vsel %vm268_vm4, %v269_v13, %v270_v16  ;;  %v55_v27 = vsel %vm41_vm1, %v46_v11, 0.0  ;;  %v1337_v52 = vld [vmem:[%s1979_s2] ss:$0 sm:$0xff] }
   0xa   :  { %v64_v28 = vsel %vm61_vm3, %v62_v12, %v63_v22  ;;  %v69_v29 = vsel %vm61_vm3, %v67_v17, %v68_v20  ;;  %v70_v30 = vrot.slane %v55_v27, 1  ;;  %v277_v33 = vrot.slane %v55_v27, 2 }
   0xb   :  { %1443 = vmatmul.mubr.msk.f32.gmra.mrb[2].mxu0 %vm74_vm2, %v47_v19  ;;  %1431 = vmatprep.mubr.msk.f32.mxu1 %vm74_vm2, %v64_v28  ;;  %v66_v31 = vsel %vm61_vm3, %v63_v22, %v65_v24  ;;  %v273_v32 = vsel %vm268_vm4, %v270_v16, %v272_v25  ;;  %v276_v35 = vsel %vm268_vm4, %v274_v18, %v275_v21  ;;  %v1611_v46 = vmov 1983009808  }
   0xc   :  { %1432 = vmatmul.mubr.msk.f32.vlgmr.msra.gmra.mrb[0].mxu1 %vm74_vm2, %v66_v31  ;;  %1447 = vmatprep.mubr.msk.f32.mxu0 %vm74_vm2, %v271_v26  ;;  %v71_v34 = vsel %vm61_vm3, %v68_v20, %v70_v30  ;;  %v278_v36 = vsel %vm268_vm4, %v275_v21, %v277_v33  ;;  %v1497_v39 = vpack.c.bf16 %v1339_v38, %v1338_v37  ;;  %v410_v47 = vunpack.c.l.s4 %v1611_v46 }
   0xd   :  { %1434 = vmatprep.mubr.msk.f32.mxu1 %vm74_vm2, %v69_v29  ;;  %v1501_v42 = vpack.c.bf16 %v1341_v41, %v1340_v40  ;;  %v1739_v45 = vpack.c.bf16 %v648_v44, %v647_v43  ;;  %v412_v48 = vlaneseq  ;;  %vm492_vm7 = vcmask 254976  }
   0xe   :  { %1498 = vmatprep.subr.bf16.mxu1 %v1497_v39  ;;  %v411_v53 = vunpack.c.0.s8 %v410_v47  ;;  %vm621_vm10 = vcmask 1042434   ;;  %vm623_vm11 = vcmask 1043459   ;;  %vm625_vm12 = vcmask 1044484  }
   0xf   :  { %1448 = vmatmul.mubr.msk.f32.vlgmr.msra.gmra.mrb[0].mxu0 %vm74_vm2, %v273_v32  ;;  %1500 = vmatpush3.bf16.msra.mxu1 %v1497_v39  ;;  %v1745_v54 = vshrl.u32 %v412_v48, 7  ;;  %vm627_vm13 = vcmask 1045509   ;;  %vm629_vm14 = vcmask 1046534   ;;  %vm631_vm15 = vcmask 1047559  }
  0x10   :  { %1435 = vmatmul.mubr.msk.f32.gmra.mrb[2].mxu1 %vm74_vm2, %v71_v34  ;;  %1450 = vmatprep.mubr.msk.f32.mxu0 %vm74_vm2, %v276_v35  ;;  %vm666_vm0 = vcmask 261120  }
  0x11   :  { %1502 = vmatprep.subr.bf16.mxu1 %v1501_v42  ;;  %v1748_v61 = vsub.s32 %v411_v53, %v1745_v54 }
  0x13   :  { %1451 = vmatmul.mubr.msk.f32.gmra.mrb[2].mxu0 %vm74_vm2, %v278_v36  ;;  %1504 = vmatpush3.bf16.msra.mxu1 %v1501_v42 }
  0x14   :  { %1506 = vmatprep.subr.bf16.mxu1 %v1739_v45 }
  0xdf   :  { %v1433_v49 = vpop.f32.mrb[0].mxu1 }
  0xe0   :  { %v153_v50 = vpop.f32.mrb[1].mxu1 }
  0xe2   :  { %v1449_v51 = vpop.f32.mrb[0].mxu0 }
  0xe3   :  { %v1559_v55 = vadd.f32 %v1449_v51, %v1433_v49  ;;  %v358_v56 = vpop.f32.mrb[1].mxu0  ;;  %v1436_v57 = vpop.f32.mrb[2].mxu1 }
  0xe4   :  { %v1560_v58 = vadd.f32 %v358_v56, %v153_v50  ;;  %v163_v59 = vpop.f32.mrb[3].mxu1 }
  0xe5   :  { %v389_v60 = vadd.f32 %v1559_v55, %v1337_v52 }
  0xe6   :  { %v388_v62 = vadd.f32 %v1560_v58, %v1337_v52  ;;  %v1452_v63 = vpop.f32.mrb[2].mxu0 }
  0xe7   :  { %vm393_vm5 = vcmp.ge.f32.partialorder %v389_v60, 0.0  ;;  %v397_v0 = vmul.f32 0.9, %v389_v60  ;;  %v1561_v1 = vadd.f32 %v1452_v63, %v1436_v57  ;;  %v368_v2 = vpop.f32.mrb[3].mxu0 }
  0xe8   :  { %vm392_vm6 = vcmp.ge.f32.partialorder %v388_v62, 0.0  ;;  %v396_v3 = vmul.f32 0.9, %v388_v62  ;;  %v1562_v4 = vadd.f32 %v368_v2, %v163_v59 }
  0xe9   :  { %v401_v5 = vsel %vm393_vm5, %v389_v60, %v397_v0  ;;  %v391_v14 = vadd.f32 %v1561_v1, %v1337_v52  ;;  %vm1090_vm5 = vcmask 523264  }
  0xea   :  { %v425_v6 = vcombine.high %v401_v5, %v401_v5  ;;  %v432_v7 = vrot.slane %v401_v5, %v1748_v61  ;;  %v400_v8 = vsel %vm392_vm6, %v388_v62, %v396_v3  ;;  %v390_v41 = vadd.f32 %v1562_v4, %v1337_v52 }
  0xeb   :  { %v408_v9 = vcombine.high %v400_v8, %v400_v8  ;;  %v415_v10 = vrot.slane %v400_v8, %v1748_v61  ;;  %v399_v30 = vmul.f32 0.9, %v391_v14  ;;  %vm395_vm8 = vcmp.ge.f32.partialorder %v391_v14, 0.0 }
  0xec   :  { %v439_v11 = vrot.slane %v425_v6, %v1748_v61  ;;  %v440_v12 = vcombine.high %v432_v7, %v432_v7  ;;  %v521_v13 = vsel %vm492_vm7, %v432_v7, -inf  ;;  %vm394_vm9 = vcmp.ge.f32.partialorder %v390_v41, 0.0 }
  0xed   :  { %v522_v15 = vrot.slane %v521_v13, 4  ;;  %v422_v16 = vrot.slane %v408_v9, %v1748_v61  ;;  %v423_v17 = vcombine.high %v415_v10, %v415_v10  ;;  %v493_v18 = vsel %vm492_vm7, %v415_v10, -inf }
  0xee   :  { %v441_v19 = vcombine.high %v439_v11, %v439_v11  ;;  %v528_v20 = vsel %vm492_vm7, %v440_v12, -inf  ;;  %v535_v21 = vsel %vm492_vm7, %v439_v11, -inf  ;;  %v494_v22 = vrot.slane %v493_v18, 4 }
  0xef   :  { %v523_v23 = vmax.f32 %v521_v13, %v522_v15  ;;  %v529_v24 = vrot.slane %v528_v20, 4  ;;  %v536_v25 = vrot.slane %v535_v21, 4  ;;  %v424_v26 = vcombine.high %v422_v16, %v422_v16 }
  0xf0   :  { %v495_v27 = vmax.f32 %v493_v18, %v494_v22  ;;  %v500_v28 = vsel %vm492_vm7, %v423_v17, -inf  ;;  %v507_v29 = vsel %vm492_vm7, %v422_v16, -inf  ;;  %v542_v39 = vsel %vm492_vm7, %v441_v19, -inf }
  0xf1   :  { %v524_v31 = vrot.slane %v523_v23, 2  ;;  %v530_v32 = vmax.f32 %v528_v20, %v529_v24  ;;  %v537_v33 = vmax.f32 %v535_v21, %v536_v25  ;;  %v501_v35 = vrot.slane %v500_v28, 4 }
  0xf2   :  { %v496_v34 = vrot.slane %v495_v27, 2  ;;  %v508_v36 = vrot.slane %v507_v29, 4  ;;  %v514_v37 = vsel %vm492_vm7, %v424_v26, -inf  ;;  %v403_v46 = vsel %vm395_vm8, %v391_v14, %v399_v30 }
  0xf3   :  { %v525_v38 = vmax.f32 %v523_v23, %v524_v31  ;;  %v515_v40 = vrot.slane %v514_v37, 4  ;;  %v531_v42 = vrot.slane %v530_v32, 2  ;;  %v502_v43 = vmax.f32 %v500_v28, %v501_v35 }
  0xf4   :  { %v509_v44 = vmax.f32 %v507_v29, %v508_v36  ;;  %v538_v48 = vrot.slane %v537_v33, 2  ;;  %v497_v49 = vmax.f32 %v495_v27, %v496_v34  ;;  %v459_v55 = vcombine.high %v403_v46, %v403_v46 }
  0xf5   :  { %v526_v47 = vrot.slane %v525_v38, 1  ;;  %v516_v50 = vmax.f32 %v514_v37, %v515_v40  ;;  %v503_v51 = vrot.slane %v502_v43, 2  ;;  %v532_v57 = vmax.f32 %v530_v32, %v531_v42 }
  0xf6   :  { %v510_v53 = vrot.slane %v509_v44, 2  ;;  %v543_v58 = vrot.slane %v542_v39, 4  ;;  %v466_v60 = vrot.slane %v403_v46, %v1748_v61  ;;  %v539_v52 = vmax.f32 %v537_v33, %v538_v48 }
  0xf7   :  { %v517_v56 = vrot.slane %v516_v50, 2  ;;  %v504_v59 = vmax.f32 %v502_v43, %v503_v51  ;;  %v1763_v62 = vmax.f32 %v525_v38, %v526_v47  ;;  %v498_v63 = vrot.slane %v497_v49, 1 }
  0xf8   :  { %v473_v0 = vrot.slane %v459_v55, %v1748_v61  ;;  %v511_v1 = vmax.f32 %v509_v44, %v510_v53  ;;  %v474_v2 = vcombine.high %v466_v60, %v466_v60  ;;  %v577_v3 = vsel %vm492_vm7, %v466_v60, -inf }
  0xf9   :  { %v398_v4 = vmul.f32 0.9, %v390_v41  ;;  %v518_v5 = vmax.f32 %v516_v50, %v517_v56  ;;  %v578_v7 = vrot.slane %v577_v3, 4  ;;  %v533_v9 = vrot.slane %v532_v57, 1 }
  0xfa   :  { %v475_v6 = vcombine.high %v473_v0, %v473_v0  ;;  %v591_v8 = vsel %vm492_vm7, %v473_v0, -inf  ;;  %v505_v10 = vrot.slane %v504_v59, 1  ;;  %v584_v11 = vsel %vm492_vm7, %v474_v2, -inf }
  0xfb   :  { %v592_v12 = vrot.slane %v591_v8, 4  ;;  %v540_v13 = vrot.slane %v539_v52, 1  ;;  %v579_v14 = vmax.f32 %v577_v3, %v578_v7  ;;  %v585_v15 = vrot.slane %v584_v11, 4 }
  0xfc   :  { %v598_v16 = vsel %vm492_vm7, %v475_v6, -inf  ;;  %v512_v17 = vrot.slane %v511_v1, 1  ;;  %v402_v20 = vsel %vm394_vm9, %v390_v41, %v398_v4  ;;  %v519_v21 = vrot.slane %v518_v5, 1 }
  0xfd   :  { %v593_v18 = vmax.f32 %v591_v8, %v592_v12  ;;  %v599_v19 = vrot.slane %v598_v16, 4  ;;  %v586_v22 = vmax.f32 %v584_v11, %v585_v15  ;;  %v442_v23 = vcombine.high %v402_v20, %v402_v20 }
  0xfe   :  { %v449_v24 = vrot.slane %v402_v20, %v1748_v61  ;;  %v499_v25 = vmax.f32 %v497_v49, %v498_v63  ;;  %v506_v26 = vmax.f32 %v504_v59, %v505_v10  ;;  %v544_v28 = vmax.f32 %v542_v39, %v543_v58 }
  0xff   :  { %v600_v27 = vmax.f32 %v598_v16, %v599_v19  ;;  %v534_v29 = vmax.f32 %v532_v57, %v533_v9  ;;  %v580_v30 = vrot.slane %v579_v14, 2  ;;  %v456_v31 = vrot.slane %v442_v23, %v1748_v61 }
 0x100   :  { %v457_v32 = vcombine.high %v449_v24, %v449_v24  ;;  %v513_v33 = vmax.f32 %v511_v1, %v512_v17  ;;  %v594_v34 = vrot.slane %v593_v18, 2  ;;  %v549_v35 = vsel %vm492_vm7, %v449_v24, -inf }
 0x101   :  { %v545_v36 = vrot.slane %v544_v28, 2  ;;  %v520_v37 = vmax.f32 %v518_v5, %v519_v21  ;;  %v587_v38 = vrot.slane %v586_v22, 2  ;;  %v458_v40 = vcombine.high %v456_v31, %v456_v31 }
 0x102   :  { %v550_v41 = vrot.slane %v549_v35, 4  ;;  %v622_v42 = vsel %vm621_vm10, %v506_v26, %v499_v25  ;;  %v601_v43 = vrot.slane %v600_v27, 2  ;;  %v556_v39 = vsel %vm492_vm7, %v457_v32, -inf }
 0x103   :  { %v563_v44 = vsel %vm492_vm7, %v456_v31, -inf  ;;  %v581_v46 = vmax.f32 %v579_v14, %v580_v30  ;;  %v557_v48 = vrot.slane %v556_v39, 4  ;;  %v541_v49 = vmax.f32 %v539_v52, %v540_v13 }
 0x104   :  { %v551_v47 = vmax.f32 %v549_v35, %v550_v41  ;;  %v595_v50 = vmax.f32 %v593_v18, %v594_v34  ;;  %v564_v51 = vrot.slane %v563_v44, 4  ;;  %v570_v53 = vsel %vm492_vm7, %v458_v40, -inf }
 0x105   :  { %v546_v55 = vmax.f32 %v544_v28, %v545_v36  ;;  %v588_v56 = vmax.f32 %v586_v22, %v587_v38  ;;  %v558_v58 = vmax.f32 %v556_v39, %v557_v48  ;;  %v571_v59 = vrot.slane %v570_v53, 4 }
 0x106   :  { %v552_v57 = vrot.slane %v551_v47, 2  ;;  %v602_v60 = vmax.f32 %v600_v27, %v601_v43  ;;  %v565_v63 = vmax.f32 %v563_v44, %v564_v51  ;;  %v624_v1 = vsel %vm623_vm11, %v513_v33, %v622_v42  ;;  %v649_v44 = vld [vmem:[%s1980_s3 + $0x10] sm:$0xff] }
 0x107   :  { %v547_v0 = vrot.slane %v546_v55, 1  ;;  %v559_v3 = vrot.slane %v558_v58, 2  ;;  %v572_v4 = vmax.f32 %v570_v53, %v571_v59  ;;  %v626_v52 = vsel %vm625_vm12, %v520_v37, %v624_v1  ;;  %v1110_v1 = vld [vmem:[%s1982_s5 + $0x88] sm:$0xff] }
 0x108   :  { %v553_v2 = vmax.f32 %v551_v47, %v552_v57  ;;  %v582_v5 = vrot.slane %v581_v46, 1  ;;  %v566_v6 = vrot.slane %v565_v63, 2  ;;  %v628_v8 = vsel %vm627_vm13, %v1763_v62, %v626_v52  ;;  %v1347_v57 = vld [vmem:[%s1980_s3 + $0x48] sm:$0xff]  ;;  %v1111_v52 = vld [vmem:[%s1982_s5 + $0x90] sm:$0xff] }
 0x109   :  { %v548_v7 = vmax.f32 %v546_v55, %v547_v0  ;;  %v560_v10 = vmax.f32 %v558_v58, %v559_v3  ;;  %v573_v11 = vrot.slane %v572_v4, 2  ;;  %v630_v12 = vsel %vm629_vm14, %v534_v29, %v628_v8  ;;  %v1095_v8 = vld [vmem:[%s1982_s5 + $0x10] sm:$0xff] }
 0x10a   :  { %v554_v9 = vrot.slane %v553_v2, 1  ;;  %v589_v13 = vrot.slane %v588_v56, 1  ;;  %v567_v14 = vmax.f32 %v565_v63, %v566_v6  ;;  %v632_v15 = vsel %vm631_vm15, %v541_v49, %v630_v12  ;;  %v1349_v63 = vld [vmem:[%s1980_s3 + $0x58] sm:$0xff] }
 0x10b   :  { %v645_v16 = vsel %vm41_vm1, %v548_v7, 0.0  ;;  %v561_v17 = vrot.slane %v560_v10, 1  ;;  %v574_v18 = vmax.f32 %v572_v4, %v573_v11  ;;  %v643_v19 = vsel %vm41_vm1, 0.0, %v632_v15  ;;  %v1094_v4 = vld [vmem:[%s1982_s5 + $0x8] sm:$0xff] }
 0x10c   :  { %v603_v20 = vrot.slane %v602_v60, 1  ;;  %v555_v21 = vmax.f32 %v553_v2, %v554_v9  ;;  %v568_v22 = vrot.slane %v567_v14, 1  ;;  %v655_v23 = vrot.slane %v643_v19, 1  ;;  %v1093_v2 = vld [vmem:[%s1982_s5] sm:$0xff]  ;;  %v1096_v9 = vld [vmem:[%s1982_s5 + $0x18] sm:$0xff]  ;;  %v1114_v11 = vld [vmem:[%s1982_s5 + $0xa8] sm:$0xff] }
 0x10d   :  { %v656_v62 = vrot.slane %v645_v16, 1  ;;  %v562_v24 = vmax.f32 %v560_v10, %v561_v17  ;;  %v575_v25 = vrot.slane %v574_v18, 1  ;;  %v825_v26 = vrot.slane %v643_v19, 2  ;;  %v1113_v10 = vld [vmem:[%s1982_s5 + $0xa0] sm:$0xff]  ;;  %v1098_v15 = vld [vmem:[%s1982_s5 + $0x28] sm:$0xff]  ;;  %v1116_v17 = vld [vmem:[%s1982_s5 + $0xb8] sm:$0xff] }
 0x10e   :  { %v826_v27 = vrot.slane %v645_v16, 2  ;;  %v596_v28 = vrot.slane %v595_v50, 1  ;;  %v569_v29 = vmax.f32 %v567_v14, %v568_v22  ;;  %v604_v33 = vmax.f32 %v602_v60, %v603_v20  ;;  %v1348_v60 = vld [vmem:[%s1980_s3 + $0x50] sm:$0xff]  ;;  %v1097_v14 = vld [vmem:[%s1982_s5 + $0x20] sm:$0xff] }
 0x10f   :  { %v657_v30 = vsel %vm61_vm3, %v655_v23, %v656_v62  ;;  %v576_v31 = vmax.f32 %v574_v18, %v575_v25  ;;  %v633_v32 = vsel %vm621_vm10, %v562_v24, %v555_v21  ;;  %v583_v35 = vmax.f32 %v581_v46, %v582_v5  ;;  %v650_v46 = vld [vmem:[%s1980_s3 + $0x18] sm:$0xff]  ;;  %v1115_v16 = vld [vmem:[%s1982_s5 + $0xb0] sm:$0xff]  ;;  %v1117_v22 = vld [vmem:[%s1982_s5 + $0xc0] sm:$0xff] }
 0x110   :  { %1461 = vmatprep.mubr.msk.f32.mxu1 %vm666_vm0, %v657_v30  ;;  %v827_v34 = vsel %vm268_vm4, %v825_v26, %v826_v27  ;;  %v634_v36 = vsel %vm623_vm11, %v569_v29, %v633_v32  ;;  %v590_v37 = vmax.f32 %v588_v56, %v589_v13  ;;  %v597_v40 = vmax.f32 %v595_v50, %v596_v28  ;;  %v1346_v56 = vld [vmem:[%s1980_s3 + $0x40] sm:$0xff]  ;;  %v1112_v5 = vld [vmem:[%s1982_s5 + $0x98] sm:$0xff]  ;;  %v1099_v20 = vld [vmem:[%s1982_s5 + $0x30] sm:$0xff] }
 0x111   :  { %v635_v38 = vsel %vm625_vm12, %v576_v31, %v634_v36  ;;  %v646_v43 = vsel %vm41_vm1, %v604_v33, 0.0  ;;  %v1509_v53 = vpack.c.bf16 %v650_v46, %v649_v44  ;;  %v1513_v59 = vpack.c.bf16 %v1347_v57, %v1346_v56  ;;  %v1100_v21 = vld [vmem:[%s1982_s5 + $0x38] sm:$0xff]  ;;  %v1118_v23 = vld [vmem:[%s1982_s5 + $0xc8] sm:$0xff]  ;;  %v1101_v25 = vld [vmem:[%s1982_s5 + $0x40] sm:$0xff] }
 0x112   :  { %v636_v41 = vsel %vm627_vm13, %v583_v35, %v635_v38  ;;  %v659_v49 = vrot.slane %v646_v43, 1  ;;  %v829_v51 = vrot.slane %v646_v43, 2  ;;  %v1517_v0 = vpack.c.bf16 %v1349_v63, %v1348_v60  ;;  %v1102_v26 = vld [vmem:[%s1982_s5 + $0x48] sm:$0xff]  ;;  %v1119_v27 = vld [vmem:[%s1982_s5 + $0xd0] sm:$0xff]  ;;  %v1120_v28 = vld [vmem:[%s1982_s5 + $0xd8] sm:$0xff] }
 0x113   :  { %v637_v42 = vsel %vm629_vm14, %v590_v37, %v636_v41  ;;  %v1523_v6 = vpack.c.bf16 %v1094_v4, %v1093_v2  ;;  %v1525_v7 = vpack.c.bf16 %v1112_v5, %v1111_v52  ;;  %v1527_v12 = vpack.c.bf16 %v1096_v9, %v1095_v8  ;;  %v1103_v31 = vld [vmem:[%s1982_s5 + $0x50] sm:$0xff]  ;;  %v1104_v32 = vld [vmem:[%s1982_s5 + $0x58] sm:$0xff]  ;;  %v1121_v33 = vld [vmem:[%s1982_s5 + $0xe0] sm:$0xff] }
 0x114   :  { %v638_v39 = vsel %vm631_vm15, %v597_v40, %v637_v42  ;;  %v1529_v13 = vpack.c.bf16 %v1114_v11, %v1113_v10  ;;  %v1531_v18 = vpack.c.bf16 %v1098_v15, %v1097_v14  ;;  %v1535_v62 = vpack.c.bf16 %v1100_v21, %v1099_v20  ;;  %v1105_v37 = vld [vmem:[%s1982_s5 + $0x60] sm:$0xff]  ;;  %v1106_v38 = vld [vmem:[%s1982_s5 + $0x68] sm:$0xff] }
 0x115   :  { %v644_v47 = vsel %vm41_vm1, 0.0, %v638_v39  ;;  %v1537_v24 = vpack.c.bf16 %v1118_v23, %v1117_v22  ;;  %v1539_v29 = vpack.c.bf16 %v1102_v26, %v1101_v25  ;;  %v1541_v30 = vpack.c.bf16 %v1120_v28, %v1119_v27  ;;  %v1352_v41 = vld [vmem:[%s1981_s4] ss:$0 sm:$0xff] }
 0x116   :  { %v658_v48 = vrot.slane %v644_v47, 1  ;;  %v828_v50 = vrot.slane %v644_v47, 2  ;;  %v1543_v35 = vpack.c.bf16 %v1104_v32, %v1103_v31  ;;  %v1547_v40 = vpack.c.bf16 %v1106_v38, %v1105_v37 }
 0x117   :  { %vm1616_vm6 = vmmov 0   ;;  %vm1292_vm9 = vcmask 33792  }
 0x118   :  { %v660_v55 = vsel %vm61_vm3, %v658_v48, %v659_v49  ;;  %v830_v58 = vsel %vm268_vm4, %v828_v50, %v829_v51  ;;  %vm976_vm3 = vcmask 517120   ;;  %vm1041_vm4 = vcmask 1041409  }
 0x119   :  { %1462 = vmatmul.mubr.msk.f32.vlgmr.msra.gmra.mrb[4].mxu1 %vm666_vm0, %v660_v55 }
 0x11a   :  { %1508 = vmatpush3.bf16.msra.mxu1 %v1739_v45  ;;  %1472 = vmatprep.mubr.msk.f32.mxu1 %vm666_vm0, %v643_v19  ;;  %v1109_v45 = vld [vmem:[%s1982_s5 + $0x80] sm:$0xff]  ;;  %v1533_v19 = vpack.c.bf16 %v1116_v17, %v1115_v16 }
 0x11b   :  { %1510 = vmatprep.subr.bf16.mxu1 %v1509_v53  ;;  %v1521_v3 = vpack.c.bf16 %v1110_v1, %v1109_v45 }
 0x11d   :  { %1522 = vmatprep.subr.bf16.mxu0 %v1521_v3 }
 0x11e   :  { %1512 = vmatpush3.bf16.msra.mxu1 %v1509_v53  ;;  %1524 = vmatpush3.bf16.msra.mxu0 %v1523_v6 }
 0x11f   :  { %1514 = vmatprep.subr.bf16.mxu1 %v1513_v59  ;;  %1526 = vmatprep.subr.bf16.mxu0 %v1525_v7 }
 0x121   :  { %1473 = vmatmul.mubr.msk.f32.vlgmr.msra.gmra.mrb[4].mxu1 %vm666_vm0, %v644_v47 }
 0x122   :  { %1516 = vmatpush3.bf16.msra.mxu1 %v1513_v59  ;;  %1483 = vmatprep.mubr.msk.f32.mxu1 %vm666_vm0, %v827_v34  ;;  %v1122_v34 = vld [vmem:[%s1982_s5 + $0xe8] sm:$0xff] }
 0x123   :  { %1518 = vmatprep.subr.bf16.mxu1 %v1517_v0  ;;  %1528 = vmatpush3.bf16.msra.mxu0 %v1527_v12  ;;  %v1545_v36 = vpack.c.bf16 %v1122_v34, %v1121_v33 }
 0x124   :  { %1530 = vmatprep.subr.bf16.mxu0 %v1529_v13 }
 0x126   :  { %1520 = vmatpush3.bf16.msra.mxu1 %v1517_v0 }
 0x127   :  { %1532 = vmatpush3.bf16.msra.mxu0 %v1531_v18 }
 0x128   :  { %1534 = vmatprep.subr.bf16.mxu0 %v1533_v19 }
 0x129   :  { %1484 = vmatmul.mubr.msk.f32.vlgmr.msra.gmra.mrb[4].mxu1 %vm666_vm0, %v830_v58 }
 0x12b   :  { %1536 = vmatpush3.bf16.msra.mxu0 %v1535_v62 }
 0x12c   :  { %1538 = vmatprep.subr.bf16.mxu0 %v1537_v24 }
 0x12f   :  { %1540 = vmatpush3.bf16.msra.mxu0 %v1539_v29 }
 0x130   :  { %1542 = vmatprep.subr.bf16.mxu0 %v1541_v30 }
 0x133   :  { %1544 = vmatpush3.bf16.msra.mxu0 %v1543_v35 }
 0x134   :  { %1546 = vmatprep.subr.bf16.mxu0 %v1545_v36 }
 0x137   :  { %1548 = vmatpush3.bf16.msra.mxu0 %v1547_v40 }
 0x1fc   :  { %v1485_v42 = vpop.f32.mrb[4].mxu1 }
 0x1fd   :  { %v925_v43 = vadd.f32 %v1485_v42, %v1352_v41  ;;  %v906_v39 = vpop.f32.mrb[5].mxu1 }
 0x1fe   :  { %v924_v44 = vadd.f32 %v1352_v41, %v906_v39  ;;  %v1612_v41 = vmov 1934713408  }
 0x1ff   :  { %vm927_vm1 = vcmp.ge.f32.partialorder %v925_v43, 0.0  ;;  %v929_v46 = vmul.f32 0.9, %v925_v43  ;;  %v1067_v42 = vunpack.c.l.s4 %v1612_v41 }
 0x200   :  { %vm926_vm2 = vcmp.ge.f32.partialorder %v924_v44, 0.0  ;;  %v928_v47 = vmul.f32 0.9, %v924_v44 }
 0x201   :  { %v931_v48 = vsel %vm927_vm1, %v925_v43, %v929_v46 }
 0x202   :  { %v951_v49 = vcombine.high %v931_v48, %v931_v48  ;;  %v958_v50 = vrot.slane %v931_v48, %v1748_v61  ;;  %v930_v51 = vsel %vm926_vm2, %v924_v44, %v928_v47 }
 0x203   :  { %v934_v53 = vcombine.high %v930_v51, %v930_v51  ;;  %v941_v55 = vrot.slane %v930_v51, %v1748_v61 }
 0x204   :  { %v965_v56 = vrot.slane %v951_v49, %v1748_v61  ;;  %v966_v57 = vcombine.high %v958_v50, %v958_v50  ;;  %v1005_v58 = vsel %vm976_vm3, %v958_v50, -inf }
 0x205   :  { %v1006_v59 = vrot.slane %v1005_v58, 4  ;;  %v948_v60 = vrot.slane %v934_v53, %v1748_v61  ;;  %v949_v63 = vcombine.high %v941_v55, %v941_v55  ;;  %v977_v0 = vsel %vm976_vm3, %v941_v55, -inf  ;;  %v1123_v55 = vld [vmem:[%s1982_s5 + $0xf0] sm:$0xff] }
 0x206   :  { %v967_v45 = vcombine.high %v965_v56, %v965_v56  ;;  %v1012_v1 = vsel %vm976_vm3, %v966_v57, -inf  ;;  %v1019_v2 = vsel %vm976_vm3, %v965_v56, -inf  ;;  %v978_v3 = vrot.slane %v977_v0, 4  ;;  %v1124_v56 = vld [vmem:[%s1982_s5 + $0xf8] sm:$0xff] }
 0x207   :  { %v1007_v4 = vmax.f32 %v1005_v58, %v1006_v59  ;;  %v1013_v52 = vrot.slane %v1012_v1, 4  ;;  %v1020_v5 = vrot.slane %v1019_v2, 4  ;;  %v950_v6 = vcombine.high %v948_v60, %v948_v60 }
 0x208   :  { %v1026_v7 = vsel %vm976_vm3, %v967_v45, -inf  ;;  %v979_v8 = vmax.f32 %v977_v0, %v978_v3  ;;  %v984_v9 = vsel %vm976_vm3, %v949_v63, -inf  ;;  %v991_v10 = vsel %vm976_vm3, %v948_v60, -inf  ;;  %v1107_v63 = vld [vmem:[%s1982_s5 + $0x70] sm:$0xff]  ;;  %v1108_v0 = vld [vmem:[%s1982_s5 + $0x78] sm:$0xff]  ;;  %s1614_s5 = smov 64  }
 0x209   :  { %v1008_v11 = vrot.slane %v1007_v4, 2  ;;  %v1014_v12 = vmax.f32 %v1012_v1, %v1013_v52  ;;  %v1021_v13 = vmax.f32 %v1019_v2, %v1020_v5  ;;  %v1027_v14 = vrot.slane %v1026_v7, 4 }
 0x20a   :  { %v980_v15 = vrot.slane %v979_v8, 2  ;;  %v985_v16 = vrot.slane %v984_v9, 4  ;;  %v992_v17 = vrot.slane %v991_v10, 4  ;;  %v998_v18 = vsel %vm976_vm3, %v950_v6, -inf }
 0x20b   :  { %v1009_v19 = vmax.f32 %v1007_v4, %v1008_v11  ;;  %v1015_v20 = vrot.slane %v1014_v12, 2  ;;  %v1022_v21 = vrot.slane %v1021_v13, 2  ;;  %v1028_v22 = vmax.f32 %v1026_v7, %v1027_v14 }
 0x20c   :  { %v981_v23 = vmax.f32 %v979_v8, %v980_v15  ;;  %v986_v62 = vmax.f32 %v984_v9, %v985_v16  ;;  %v993_v24 = vmax.f32 %v991_v10, %v992_v17  ;;  %v999_v25 = vrot.slane %v998_v18, 4 }
 0x20d   :  { %v1010_v26 = vrot.slane %v1009_v19, 1  ;;  %v1016_v27 = vmax.f32 %v1014_v12, %v1015_v20  ;;  %v1023_v28 = vmax.f32 %v1021_v13, %v1022_v21  ;;  %v1029_v29 = vrot.slane %v1028_v22, 2 }
 0x20e   :  { %v987_v30 = vrot.slane %v986_v62, 2  ;;  %v994_v31 = vrot.slane %v993_v24, 2  ;;  %v1000_v32 = vmax.f32 %v998_v18, %v999_v25  ;;  %v982_v36 = vrot.slane %v981_v23, 1  ;;  %v1208_v25 = vld [vmem:[%s1984_s7 + $0x18] sm:$0xff] }
 0x20f   :  { %v1017_v33 = vrot.slane %v1016_v27, 1  ;;  %v1024_v34 = vrot.slane %v1023_v28, 1  ;;  %v1030_v35 = vmax.f32 %v1028_v22, %v1029_v29  ;;  %v1011_v43 = vmax.f32 %v1009_v19, %v1010_v26 }
 0x210   :  { %v988_v37 = vmax.f32 %v986_v62, %v987_v30  ;;  %v995_v38 = vmax.f32 %v993_v24, %v994_v31  ;;  %v1001_v40 = vrot.slane %v1000_v32, 2  ;;  %v983_v50 = vmax.f32 %v981_v23, %v982_v36  ;;  %v1207_v24 = vld [vmem:[%s1984_s7 + $0x10] sm:$0xff] }
 0x211   :  { %v1018_v39 = vmax.f32 %v1016_v27, %v1017_v33  ;;  %v1025_v44 = vmax.f32 %v1023_v28, %v1024_v34  ;;  %v1031_v46 = vrot.slane %v1030_v35, 1  ;;  %v1068_v1 = vunpack.c.0.s8 %v1067_v42  ;;  %v1353_v28 = vld [vmem:[%s1983_s6] ss:$0 sm:$0xff]  ;;  %s1617_s6 = smov [#allocation2]  }
 0x212   :  { %v989_v47 = vrot.slane %v988_v37, 1  ;;  %v996_v48 = vrot.slane %v995_v38, 1  ;;  %v1002_v49 = vmax.f32 %v1000_v32, %v1001_v40  ;;  %v1549_v2 = vpack.c.bf16 %v1124_v56, %v1123_v55  ;;  %v1354_v34 = vld [vmem:[%s1985_s8] ss:$0 sm:$0xff] }
 0x213   :  { %v1032_v51 = vmax.f32 %v1030_v35, %v1031_v46  ;;  %v1045_v53 = vsel %vm1041_vm4, %v1018_v39, %v1011_v43  ;;  %v1551_v3 = vpack.c.bf16 %v1108_v0, %v1107_v63  ;;  %v1071_v9 = vsub.s32 %v1068_v1, %v1745_v54  ;;  %v1205_v54 = vld [vmem:[%s1984_s7] sm:$0xff] }
 0x214   :  { %v990_v57 = vmax.f32 %v988_v37, %v989_v47  ;;  %v997_v58 = vmax.f32 %v995_v38, %v996_v48  ;;  %v1003_v59 = vrot.slane %v1002_v49, 1  ;;  %v1046_v60 = vsel %vm621_vm10, %v1025_v44, %v1045_v53  ;;  %1550 = vmatprep.subr.bf16.mxu0 %v1549_v2 }
 0x215   :  { %v1047_v45 = vsel %vm623_vm11, %v1032_v51, %v1046_v60  ;;  %1552 = vmatpush3.bf16.msra.mxu0 %v1551_v3  ;;  %v1613_v14 = vmov 0.0   ;;  %v1615_v62 = vmov 0.0|0.0   ;;  %v1557_v26 = vpack.c.bf16 %v1208_v25, %v1207_v24 }
 0x216   :  { %v1004_v4 = vmax.f32 %v1002_v49, %v1003_v59  ;;  %v1042_v52 = vsel %vm1041_vm4, %v990_v57, %v983_v50  ;;  %v1063_v6 = vrot.slane %v1047_v45, %v1748_v61  ;;  %1553 = vmatprep.subr.bf16.mxu1 %v1615_v62  ;;  %1494 = vmatprep.mubr.msk.f32.mxu1 %vm1616_vm6, %v1613_v14 }
 0x217   :  { %v1043_v5 = vsel %vm621_vm10, %v997_v58, %v1042_v52 }
 0x218   :  { %v1044_v7 = vsel %vm623_vm11, %v1004_v4, %v1043_v5 }
 0x219   :  { %v1055_v8 = vrot.slane %v1044_v7, %v1748_v61  ;;  %v1206_v61 = vld [vmem:[%s1984_s7 + $0x8] sm:$0xff]  ;;  %s1312_s7 = sshll.u32 %s1617_s6, 4  ;;  %s1313_s7 = int_to_ptr.vmem [resolvable:$true] %s1312_s7 }
 0x21a   :  { %v1554_v23 = vpack.c.bf16 %v1206_v61, %v1205_v54  ;;  %s1587_s8 = scalar_lea.vmem %s1313_s7, 32  ;;  %p1592_p1 = scmp.lt.s32.totalorder %s1313_s7, %s1313_s7 }
 0x21b   :  { %v1064_v10 = vcombine.low %v1055_v8, %v1063_v6  ;;  %v1065_v11 = vcombine.high %v1055_v8, %v1063_v6  ;;  %p1588_p0 = scmp.ne.s32.totalorder %s1313_s7, %s1587_s8  ;;  %p1593_p2 = scmp.lt.s32.totalorder %s1587_s8, %s1587_s8 }
 0x21c   :  { %1555 = vmatpush3.bf16.msra.mxu1 %v1554_v23 }
 0x21d   :  { %v1072_v12 = vrot.slane %v1064_v10, %v1071_v9  ;;  %v1079_v13 = vrot.slane %v1065_v11, %v1071_v9  ;;  %1556 = vmatprep.subr.bf16.mxu1 %v1615_v62  ;;  %p1594_p3 = por %p1593_p2, %p1592_p1 }
 0x21f   :  { %v1080_v15 = vcombine.high %v1072_v12, %v1613_v14  ;;  %v1081_v16 = vcombine.high %v1079_v13, %v1613_v14  ;;  %p1595_p4 = pnand %p1594_p3, %p1588_p0 }
 0x220   :  { %1558 = vmatpush3.bf16.msra.mxu1 %v1557_v26 }
 0x221   :  { %v1578_v17 = vpack.i.bf16 %v1080_v15, %v1081_v16 }
 0x223   :  { %1579 = vrot.lane.b32.xlu0 %v1578_v17, %s1614_s5 }
 0x295   :  { %v1580_v18 = vpop.permute.xlu0 %1579 }
 0x296   :  { %v1582_v19 = vunpack.i.h.bf16 %v1580_v18  ;;  %v1581_v20 = vunpack.i.l.bf16 %v1580_v18 }
 0x298   :  { %v1092_v21 = vsel %vm1090_vm5, %v1079_v13, %v1581_v20  ;;  %v1091_v22 = vsel %vm1090_vm5, %v1072_v12, %v1582_v19 }
 0x299   :  { %1196 = vmatprep.mubr.f32.mxu0 %v1092_v21 }
 0x29a   :  { %1197 = vmatmul.mubr.f32.vlgmr.msra.gmra.mrb[4].mxu0 %v1091_v22 }
 0x36d   :  { %v1421_v27 = vpop.f32.mrb[4].mxu0 }
 0x36e   :  { %v1422_v29 = vpop.f32.mrb[5].mxu0 }
 0x36f   :  { %v1423_v30 = vadd.f32 %v1422_v29, %v1421_v27 }
 0x371   :  { %v1199_v31 = vadd.f32 %v1423_v30, %v1353_v28 }
 0x373   :  { %vm1202_vm7 = vcmp.ge.f32.partialorder %v1199_v31, 0.0  ;;  %v1203_v32 = vmul.f32 0.9, %v1199_v31 }
 0x375   :  { %v1204_v33 = vsel %vm1202_vm7, %v1199_v31, %v1203_v32 }
 0x376   :  { %1495 = vmatmul.mubr.msk.f32.vlgmr.msra.gmra.mrb[6].mxu1 %vm666_vm0, %v1204_v33 }
 0x449   :  { %v1285_v35 = vpop.f32.mrb[6].mxu1 }
 0x44a   :  { %v1286_v36 = vadd.f32 %v1354_v34, %v1285_v35  ;;  %v1496_v37 = vpop.f32.mrb[7].mxu1 }
 0x44c   :  { %v1290_v38 = vmul.f32 0.9, %v1286_v36  ;;  %vm1289_vm8 = vcmp.ge.f32.partialorder %v1286_v36, 0.0 }
 0x44e   :  { %v1291_v40 = vsel %vm1289_vm8, %v1286_v36, %v1290_v38 }
 0x44f   :  { %v1293_v41 = vsel %vm1292_vm9, %v1291_v40, -inf }
 0x450   :  { %1294 = vmax.xlane.f32.xlu0 %v1293_v41 }
 0x4dd   :  { %v1295_v42 = vpop.xlane.xlu0 %1294 }
 0x4de   :  { %v1296_v43 = vsub.f32 %v1291_v40, %v1295_v42 }
 0x4e0   :  { %v1297_v39 = vmul.f32 1.442695, %v1296_v43 }
 0x4e2   :  { %1583 = vpow2.f32 %v1297_v39 }
 0x4ec   :  { %v1584_v44 = vpop.eup %1583 }
 0x4ed   :  { %v1299_v46 = vsel %vm1292_vm9, %v1584_v44, 0.0 }
 0x4ee   :  { %1300 = vadd.xlane.f32.xlu1 %v1299_v46 }
 0x57b   :  { %v1301_v47 = vpop.xlane.xlu1 %1300 }
 0x57c   :  { %1585 = vlog2.f32 %v1301_v47 }
 0x586   :  { %v1586_v48 = vpop.eup %1585 }
 0x587   :  { %v1303_v49 = vmul.f32 0.6931472, %v1586_v48 }
 0x589   :  { %v1304_v50 = vsub.f32 %v1296_v43, %v1303_v49 }
 0x58b   :  { %1305 = vst.msk [vmem:[#allocation2] sm:$0x3] %vm1292_vm9, %v1304_v50 }
 0x58c   :  { %1598 = shalt.err (!%p1595_p4)
}
 0x58d   :  { %s1599_s3 = scalar_lea.hbm %s1986_s9, 32 }
 0x58e   :  { %p1600_p5 = scmp.ne.s32.totalorder %s1986_s9, %s1599_s3  ;;  %p1603_p6 = scmp.lt.u32.totalorder %s1599_s3, %s1986_s9 }
 0x590   :  { %p1605_p7 = pnand %p1603_p6, %p1600_p5 }
 0x592   :  { %1608 = shalt.err (!%p1605_p7)
}
 0x593   :  { %1315 = dma.vmem_to_hbm [thread:$0]  %s1313_s7, 32, %s1986_s9, [#allocation3]  }
 0x594   :  { %1609 = dma.done.wait [#allocation3], 32  }
 0x595   :  { %1610 = vsyncadd [#allocation3], 4294967264 }
 0x596   :  { %1319 = vsyncpa [#allocation3], 1 }

</bundles_post_ra>
